<compile_context>
chip_gen: v7x
topology: tpu7x:2x2x1
jax: 0.10.0
libtpu: 0.0.40
codegen_flags: <defaults>
</compile_context>

<pallas_src>
import functools

import jax
import jax.numpy as jnp
import numpy as np
from jax.experimental import pallas as pl
from jax.experimental.pallas import tpu as pltpu


def _area_embedding_kernel(x_ref, tab_ref, alpha_ref, o_ref, *, n, m):
    """Computes the full AreaEmbedding loss in one shot.

    x_ref:     (n, m)    int32   co-occurrence indices per yad
    tab_ref:   (5, n, D) float32 stacked tables [wid, ken, lrg, sml, yad]
    alpha_ref: (1,)      float32 SMEM triplet margin
    o_ref:     (1, 1)    float32 SMEM scalar loss
    """
    alpha = alpha_ref[0]

    wid = tab_ref[0]
    ken = tab_ref[1]
    lrg = tab_ref[2]
    sml = tab_ref[3]
    yad = tab_ref[4]

    # hierarchical regularization: one fused elementwise expression, one reduce
    reg = jnp.sum((wid - ken) ** 2 + (wid - lrg) ** 2
                  + (lrg - sml) ** 2 + (sml - yad) ** 2)

    # pairwise squared distances among yad embeddings, pure VPU (skip the MXU:
    # an (8,32)x(32,8) matmul is <1% MXU utilization and pays push/pop latency)
    diff = yad[:, None, :] - yad[None, :, :]          # (n, n, D)
    d2 = jnp.sum(diff * diff, axis=-1)                # (n, n)   d2[i, j]

    # membership matrix: mem[i, j] = 1.0 iff j appears in x[i, :]  (vectorized)
    jidx3 = jax.lax.broadcasted_iota(jnp.int32, (n, m, n), 2)
    eq = (x_ref[...][:, :, None] == jidx3).astype(jnp.float32)   # (n, m, n)
    mem = jnp.max(eq, axis=1)                                    # (n, n)

    iidx = jax.lax.broadcasted_iota(jnp.int32, (n, n), 0)
    jidx = jax.lax.broadcasted_iota(jnp.int32, (n, n), 1)
    not_eye = (iidx != jidx).astype(jnp.float32)      # (n, n)

    pos_mask = mem * not_eye                          # j in x[i],  j != i
    neg_mask = (1.0 - mem) * not_eye                  # k not in x[i], k != i

    # vectorized triplet loss over (i, j, k):
    #   relu(d2[i,j] - d2[i,k] + alpha) summed where j in x[i], k not in x[i],
    #   i != j, i != k, j != k
    t = d2[:, :, None] - d2[:, None, :] + alpha                       # (n, n, n)
    w = pos_mask[:, :, None] * neg_mask[:, None, :] * not_eye[None, :, :]
    trip = jnp.sum(jnp.sum(w * jnp.maximum(t, 0.0), axis=0))

    o_ref[0, 0] = reg + trip


def area_embedding_loss(x, wid, ken, lrg, sml, yad, alpha=0.1):
    n, m = x.shape
    # The fused regularization (and stacked DMA) requires all five tables to
    # share the same (num, embedding_dim) shape — matching the reference use.
    for name, t in (("wid", wid), ("ken", ken), ("lrg", lrg),
                    ("sml", sml), ("yad", yad)):
        assert tuple(t.shape) == tuple(yad.shape), (
            f"{name} shape {t.shape} != yad shape {yad.shape}")

    tables = jnp.stack([wid, ken, lrg, sml, yad], axis=0).astype(jnp.float32)
    alpha_arr = jnp.asarray([alpha], jnp.float32)

    kernel = functools.partial(_area_embedding_kernel, n=n, m=m)
    out = pl.pallas_call(
        kernel,
        out_shape=jax.ShapeDtypeStruct((1, 1), jnp.float32),
        in_specs=[
            pl.BlockSpec(memory_space=pltpu.MemorySpace.VMEM),   # x (int32)
            pl.BlockSpec(memory_space=pltpu.MemorySpace.VMEM),   # stacked tables
            pl.BlockSpec(memory_space=pltpu.MemorySpace.SMEM),   # alpha scalar
        ],
        out_specs=pl.BlockSpec(memory_space=pltpu.MemorySpace.SMEM),
    )(x, tables, alpha_arr)
    return out[0, 0]


def _reference_loss(x, wid, ken, lrg, sml, yad, alpha=0.1):
    """Pure numpy transcription of the PyTorch forward."""
    x = np.asarray(x)
    wid, ken, lrg, sml, yad = (np.asarray(a, np.float64)
                               for a in (wid, ken, lrg, sml, yad))
    loss = (np.sum((wid - ken) ** 2) + np.sum((wid - lrg) ** 2)
            + np.sum((lrg - sml) ** 2) + np.sum((sml - yad) ** 2))
    n = yad.shape[0]
    for i in range(n):
        for j in range(n):
            for k in range(n):
                if i == j or j == k or i == k:
                    continue
                if (j in x[i]) and (k not in x[i]):
                    tl = (np.sum((yad[i] - yad[j]) ** 2)
                          - np.sum((yad[i] - yad[k]) ** 2) + alpha)
                    if tl > 0:
                        loss += tl
    return loss


if __name__ == "__main__":
    # small, deterministic synthetic setup
    embedding_dim = 32
    wid_num = ken_num = lrg_num = sml_num = yad_num = 8   # equal so the pairwise
    n_cooc = 4                                            # subtractions broadcast

    key = jax.random.PRNGKey(0)
    k1, k2, k3, k4, k5, kx = jax.random.split(key, 6)
    wid = jax.random.normal(k1, (wid_num, embedding_dim), jnp.float32)
    ken = jax.random.normal(k2, (ken_num, embedding_dim), jnp.float32)
    lrg = jax.random.normal(k3, (lrg_num, embedding_dim), jnp.float32)
    sml = jax.random.normal(k4, (sml_num, embedding_dim), jnp.float32)
    yad = jax.random.normal(k5, (yad_num, embedding_dim), jnp.float32)
    x = jax.random.randint(kx, (yad_num, n_cooc), 0, yad_num, dtype=jnp.int32)

    loss = jax.block_until_ready(area_embedding_loss(x, wid, ken, lrg, sml, yad))

    ref = _reference_loss(x, wid, ken, lrg, sml, yad)
    np.testing.assert_allclose(float(loss), float(ref), rtol=1e-3, atol=1e-2)
    print("KERNEL_OK")
</pallas_src>

<mosaic_0001>
module attributes {stable_mosaic.version = 11 : i64} {
  func.func @_area_embedding_kernel(%arg0: memref<8x4xi32, #tpu.memory_space<vmem>>, %arg1: memref<5x8x32xf32, #tpu.memory_space<vmem>>, %arg2: memref<1xf32, #tpu.memory_space<smem>>, %arg3: memref<1x1xf32, #tpu.memory_space<smem>>) attributes {dimension_semantics = [], scalar_prefetch = 0 : i64, scratch_operands = 0 : i64, tpu.core_type = #tpu.core_type<tc>} {
    %c0 = arith.constant 0 : index
    %0 = memref.load %arg2[%c0] : memref<1xf32, #tpu.memory_space<smem>>
    %c0_0 = arith.constant 0 : index
    %c0_1 = arith.constant 0 : index
    %c0_2 = arith.constant 0 : index
    %1 = vector.load %arg1[%c0_0, %c0_1, %c0_2] : memref<5x8x32xf32, #tpu.memory_space<vmem>>, vector<1x8x32xf32>
    %2 = vector.shape_cast %1 : vector<1x8x32xf32> to vector<8x32xf32>
    %c1 = arith.constant 1 : index
    %c0_3 = arith.constant 0 : index
    %c0_4 = arith.constant 0 : index
    %3 = vector.load %arg1[%c1, %c0_3, %c0_4] : memref<5x8x32xf32, #tpu.memory_space<vmem>>, vector<1x8x32xf32>
    %4 = vector.shape_cast %3 : vector<1x8x32xf32> to vector<8x32xf32>
    %c2 = arith.constant 2 : index
    %c0_5 = arith.constant 0 : index
    %c0_6 = arith.constant 0 : index
    %5 = vector.load %arg1[%c2, %c0_5, %c0_6] : memref<5x8x32xf32, #tpu.memory_space<vmem>>, vector<1x8x32xf32>
    %6 = vector.shape_cast %5 : vector<1x8x32xf32> to vector<8x32xf32>
    %c3 = arith.constant 3 : index
    %c0_7 = arith.constant 0 : index
    %c0_8 = arith.constant 0 : index
    %7 = vector.load %arg1[%c3, %c0_7, %c0_8] : memref<5x8x32xf32, #tpu.memory_space<vmem>>, vector<1x8x32xf32>
    %8 = vector.shape_cast %7 : vector<1x8x32xf32> to vector<8x32xf32>
    %c4 = arith.constant 4 : index
    %c0_9 = arith.constant 0 : index
    %c0_10 = arith.constant 0 : index
    %9 = vector.load %arg1[%c4, %c0_9, %c0_10] : memref<5x8x32xf32, #tpu.memory_space<vmem>>, vector<1x8x32xf32>
    %10 = vector.shape_cast %9 : vector<1x8x32xf32> to vector<8x32xf32>
    %11 = arith.subf %2, %4 : vector<8x32xf32>
    %12 = arith.mulf %11, %11 : vector<8x32xf32>
    %13 = arith.subf %2, %6 : vector<8x32xf32>
    %14 = arith.mulf %13, %13 : vector<8x32xf32>
    %15 = arith.addf %12, %14 : vector<8x32xf32>
    %16 = arith.subf %6, %8 : vector<8x32xf32>
    %17 = arith.mulf %16, %16 : vector<8x32xf32>
    %18 = arith.addf %15, %17 : vector<8x32xf32>
    %19 = arith.subf %8, %10 : vector<8x32xf32>
    %20 = arith.mulf %19, %19 : vector<8x32xf32>
    %21 = arith.addf %18, %20 : vector<8x32xf32>
    %22 = vector.shape_cast %21 : vector<8x32xf32> to vector<1x8x32xf32>
    %cst = arith.constant dense<0.000000e+00> : vector<1xf32>
    %23 = vector.multi_reduction <add>, %22, %cst [1, 2] : vector<1x8x32xf32> to vector<1xf32>
    %24 = vector.shape_cast %23 : vector<1xf32> to vector<1x1x1xf32>
    %25 = vector.extract %24[0, 0, 0] : f32 from vector<1x1x1xf32>
    %26 = vector.shape_cast %10 : vector<8x32xf32> to vector<8x1x32xf32>
    %27 = vector.shape_cast %10 : vector<8x32xf32> to vector<1x8x32xf32>
    %28 = vector.broadcast %26 : vector<8x1x32xf32> to vector<8x8x32xf32>
    %29 = vector.broadcast %27 : vector<1x8x32xf32> to vector<8x8x32xf32>
    %30 = arith.subf %28, %29 : vector<8x8x32xf32>
    %31 = arith.mulf %30, %30 : vector<8x8x32xf32>
    %cst_11 = arith.constant dense<0.000000e+00> : vector<8x8xf32>
    %32 = vector.multi_reduction <add>, %31, %cst_11 [2] : vector<8x8x32xf32> to vector<8x8xf32>
    %33 = tpu.iota {dimensions = array<i32: 2>} : vector<8x4x8xi32>
    %c0_12 = arith.constant 0 : index
    %c0_13 = arith.constant 0 : index
    %34 = vector.load %arg0[%c0_12, %c0_13] : memref<8x4xi32, #tpu.memory_space<vmem>>, vector<8x4xi32>
    %35 = vector.shape_cast %34 : vector<8x4xi32> to vector<8x4x1xi32>
    %36 = vector.broadcast %35 : vector<8x4x1xi32> to vector<8x4x8xi32>
    %37 = arith.cmpi eq, %36, %33 : vector<8x4x8xi32>
    %38 = arith.extui %37 : vector<8x4x8xi1> to vector<8x4x8xi32>
    %39 = arith.sitofp %38 : vector<8x4x8xi32> to vector<8x4x8xf32>
    %cst_14 = arith.constant dense<0xFF800000> : vector<8x8xf32>
    %40 = vector.multi_reduction <maximumf>, %39, %cst_14 [1] : vector<8x4x8xf32> to vector<8x8xf32>
    %41 = tpu.iota {dimensions = array<i32: 0>} : vector<8x8xi32>
    %42 = tpu.iota {dimensions = array<i32: 1>} : vector<8x8xi32>
    %43 = arith.cmpi ne, %41, %42 : vector<8x8xi32>
    %44 = arith.extui %43 : vector<8x8xi1> to vector<8x8xi32>
    %45 = arith.sitofp %44 : vector<8x8xi32> to vector<8x8xf32>
    %46 = arith.mulf %40, %45 : vector<8x8xf32>
    %cst_15 = arith.constant 1.000000e+00 : f32
    %47 = vector.broadcast %cst_15 : f32 to vector<8x8xf32>
    %48 = arith.subf %47, %40 : vector<8x8xf32>
    %49 = arith.mulf %48, %45 : vector<8x8xf32>
    %50 = vector.shape_cast %32 : vector<8x8xf32> to vector<8x8x1xf32>
    %51 = vector.shape_cast %32 : vector<8x8xf32> to vector<8x1x8xf32>
    %52 = vector.broadcast %50 : vector<8x8x1xf32> to vector<8x8x8xf32>
    %53 = vector.broadcast %51 : vector<8x1x8xf32> to vector<8x8x8xf32>
    %54 = arith.subf %52, %53 : vector<8x8x8xf32>
    %55 = vector.broadcast %0 : f32 to vector<8x8x8xf32>
    %56 = arith.addf %54, %55 : vector<8x8x8xf32>
    %57 = vector.shape_cast %46 : vector<8x8xf32> to vector<8x8x1xf32>
    %58 = vector.shape_cast %49 : vector<8x8xf32> to vector<8x1x8xf32>
    %59 = vector.broadcast %57 : vector<8x8x1xf32> to vector<8x8x8xf32>
    %60 = vector.broadcast %58 : vector<8x1x8xf32> to vector<8x8x8xf32>
    %61 = arith.mulf %59, %60 : vector<8x8x8xf32>
    %62 = vector.shape_cast %45 : vector<8x8xf32> to vector<1x8x8xf32>
    %63 = vector.broadcast %62 : vector<1x8x8xf32> to vector<8x8x8xf32>
    %64 = arith.mulf %61, %63 : vector<8x8x8xf32>
    %cst_16 = arith.constant 0.000000e+00 : f32
    %65 = vector.broadcast %cst_16 : f32 to vector<8x8x8xf32>
    %66 = arith.maximumf %56, %65 : vector<8x8x8xf32>
    %67 = arith.mulf %64, %66 : vector<8x8x8xf32>
    %cst_17 = arith.constant dense<0.000000e+00> : vector<8x8xf32>
    %68 = vector.multi_reduction <add>, %67, %cst_17 [0] : vector<8x8x8xf32> to vector<8x8xf32>
    %69 = vector.shape_cast %68 : vector<8x8xf32> to vector<1x8x8xf32>
    %cst_18 = arith.constant dense<0.000000e+00> : vector<1xf32>
    %70 = vector.multi_reduction <add>, %69, %cst_18 [1, 2] : vector<1x8x8xf32> to vector<1xf32>
    %71 = vector.shape_cast %70 : vector<1xf32> to vector<1x1x1xf32>
    %72 = vector.extract %71[0, 0, 0] : f32 from vector<1x1x1xf32>
    %73 = arith.addf %25, %72 : f32
    %c0_19 = arith.constant 0 : index
    %c0_20 = arith.constant 0 : index
    %74 = memref.load %arg3[%c0_19, %c0_20] : memref<1x1xf32, #tpu.memory_space<smem>>
    memref.store %73, %arg3[%c0_19, %c0_20] : memref<1x1xf32, #tpu.memory_space<smem>>
    return
  }
}

</mosaic_0001>

<bundles_post_ra>
// kernel: tpu_custom_call.1
= control target key start
LH: loop header
LB: loop body
LE: loop exit
PB: predicated region body
PF: predicated region fallthrough
CT: control target
= control target key end

     0   :  { %9 = vsyncpa [#allocation4], 0  ;;  %s937_s0 = inlined_call_operand.vmem [shape: s32[8,4], index: 0, kind: input, shape index: {}]   ;;  %s938_s1 = inlined_call_operand.hbm [shape: f32[5,8,32], index: 1, kind: input, shape index: {}]   ;;  %s939_s2 = inlined_call_operand.<no memory space> [shape: f32[1], index: 2, kind: input, shape index: {}]   ;;  %s940_s3 = inlined_call_operand.hbm [shape: f32[1,1], index: 3, kind: output, shape index: {}]  }
   0x1   :  { %10 = vsyncpa [#allocation5], 0  ;;  %s715_s12 = smov [#allocation3]   ;;  %s679_s16 = scalar_lea.hbm %s938_s1, 640 }
   0x2   :  { %s18_s13 = sshll.u32 %s715_s12, 4  ;;  %p680_p0 = scmp.ne.s32.totalorder %s938_s1, %s679_s16  ;;  %s19_s13 = int_to_ptr.vmem [resolvable:$true] %s18_s13 }
   0x3   :  { %p683_p1 = scmp.lt.u32.totalorder %s679_s16, %s938_s1 }
   0x5   :  { %p685_p2 = pnand %p683_p1, %p680_p0 }
   0x7   :  { %688 = shalt.err (!%p685_p2)
}
   0x8   :  { %s689_s21 = scalar_lea.vmem %s19_s13, 640  ;;  %p694_p4 = scmp.lt.s32.totalorder %s19_s13, %s19_s13 }
   0x9   :  { %p690_p3 = scmp.ne.s32.totalorder %s19_s13, %s689_s21  ;;  %p695_p5 = scmp.lt.s32.totalorder %s689_s21, %s689_s21 }
   0xb   :  { %p696_p6 = por %p695_p5, %p694_p4 }
   0xd   :  { %p697_p7 = pnand %p696_p6, %p690_p3 }
   0xf   :  { %700 = shalt.err (!%p697_p7)
}
  0x10   :  { %s716_s22 = smov 128   ;;  %s717_s23 = smov 8  }
  0x11   :  { %24 = dma.hbm_to_vmem [thread:$0]  %s938_s1, 640, %s19_s13, [#allocation4], %s716_s22, %s716_s22, %s717_s23  }
  0x12   :  { %711 = dma.done.wait [#allocation4], 640  }
  0x13   :  { %712 = vsyncadd [#allocation4], 4294966656  ;;  %v67_v0 = vlaneseq  ;;  %v194_v6 = vld [vmem:[%s937_s0] sm:$0xff]  ;;  %v718_v19 = vmov 1966171168   ;;  %vm51_vm0 = vcmask 261120  }
  0x14   :  { %v65_v20 = vunpack.c.l.s4 %v718_v19  ;;  %v771_v23 = vld [vmem:[#allocation3 + $0x20] sm:$0xff]  ;;  %vm275_vm1 = vcmask 60416   ;;  %vm616_vm11 = vcmask 64512   ;;  %s701_s5 = scalar_lea.hbm %s940_s3, 16 }
  0x15   :  { %v754_v1 = vshrl.u32 %v67_v0, 7  ;;  %v63_v27 = vcombine.high %v771_v23, %v771_v23  ;;  %p702_p8 = scmp.ne.s32.totalorder %s940_s3, %s701_s5  ;;  %p705_p9 = scmp.lt.u32.totalorder %s701_s5, %s940_s3 }
  0x16   :  { %v66_v21 = vunpack.c.0.s8 %v65_v20 }
  0x17   :  { %v757_v2 = vsub.s32 0, %v754_v1  ;;  %v211_v3 = vsub.s32 2, %v754_v1  ;;  %v218_v4 = vsub.s32 3, %v754_v1  ;;  %v204_v5 = vsub.s32 1, %v754_v1  ;;  %p707_p10 = pnand %p705_p9, %p702_p8 }
  0x18   :  { %v232_v11 = vsub.s32 5, %v754_v1  ;;  %v225_v12 = vsub.s32 4, %v754_v1  ;;  %v246_v15 = vsub.s32 7, %v754_v1  ;;  %v239_v16 = vsub.s32 6, %v754_v1 }
  0x19   :  { %v212_v7 = vrot.slane %v194_v6, %v211_v3  ;;  %v198_v8 = vrot.slane %v194_v6, %v757_v2  ;;  %v219_v9 = vrot.slane %v194_v6, %v218_v4  ;;  %v205_v10 = vrot.slane %v194_v6, %v204_v5 }
  0x1a   :  { %v233_v13 = vrot.slane %v194_v6, %v232_v11  ;;  %v226_v14 = vrot.slane %v194_v6, %v225_v12  ;;  %v247_v17 = vrot.slane %v194_v6, %v246_v15  ;;  %v240_v18 = vrot.slane %v194_v6, %v239_v16 }
  0x1b   :  { %214 = vbcast.lane.b32.xlu1 %v212_v7, 256  ;;  %200 = vbcast.lane.b32.xlu0 %v198_v8, 256  ;;  %v69_v22 = vsub.s32 %v66_v21, %v754_v1  ;;  %v801_v8 = vand.u32 127, %v67_v0  ;;  %v719_v11 = vmov 0.0  }
  0x1d   :  { %v70_v24 = vrot.slane %v771_v23, %v69_v22  ;;  %v77_v31 = vrot.slane %v63_v27, %v69_v22  ;;  %vm334_vm4 = vcmp.ne.s32.totalorder %v754_v1, %v801_v8 }
  0x1f   :  { %221 = vbcast.lane.b32.xlu1 %v219_v9, 256  ;;  %207 = vbcast.lane.b32.xlu0 %v205_v10, 256  ;;  %v86_v25 = vrot.slane %v70_v24, %v69_v22  ;;  %v78_v26 = vcombine.high %v70_v24, %v70_v24  ;;  %v79_v32 = vcombine.high %v77_v31, %v77_v31  ;;  %v811_v24 = vsel %vm334_vm4, 1.0, %v719_v11 }
  0x20   :  { %v93_v37 = vrot.slane %v77_v31, %v69_v22 }
  0x21   :  { %v115_v28 = vrot.slane %v86_v25, %v757_v2  ;;  %v108_v29 = vcombine.high %v86_v25, %v86_v25  ;;  %v100_v30 = vrot.slane %v78_v26, %v69_v22  ;;  %v107_v38 = vrot.slane %v79_v32, %v69_v22 }
  0x22   :  { %v131_v43 = vrot.slane %v93_v37, %v757_v2  ;;  %v109_v44 = vcombine.high %v93_v37, %v93_v37 }
  0x23   :  { %235 = vbcast.lane.b32.xlu1 %v233_v13, 256  ;;  %228 = vbcast.lane.b32.xlu0 %v226_v14, 256  ;;  %v152_v33 = vsub.f32 %v115_v28, %v771_v23  ;;  %v123_v34 = vrot.slane %v108_v29, %v757_v2  ;;  %v110_v35 = vcombine.high %v100_v30, %v100_v30 }
  0x24   :  { %v119_v36 = vrot.slane %v100_v30, %v757_v2  ;;  %v135_v45 = vrot.slane %v107_v38, %v757_v2  ;;  %v111_v49 = vcombine.high %v107_v38, %v107_v38  ;;  %v156_v51 = vsub.f32 %v131_v43, %v771_v23 }
  0x25   :  { %v160_v39 = vmul.f32 %v152_v33, %v152_v33  ;;  %v154_v40 = vsub.f32 %v123_v34, %v771_v23  ;;  %v127_v41 = vrot.slane %v110_v35, %v757_v2  ;;  %v139_v52 = vrot.slane %v109_v44, %v757_v2 }
  0x26   :  { %v153_v42 = vsub.f32 %v119_v36, %v771_v23  ;;  %v157_v55 = vsub.f32 %v135_v45, %v771_v23  ;;  %v143_v56 = vrot.slane %v111_v49, %v757_v2  ;;  %v164_v58 = vmul.f32 %v156_v51, %v156_v51 }
  0x27   :  { %249 = vbcast.lane.b32.xlu1 %v247_v17, 256  ;;  %242 = vbcast.lane.b32.xlu0 %v240_v18, 256  ;;  %v168_v46 = vsel %vm51_vm0, %v160_v39, 0.0  ;;  %v162_v47 = vmul.f32 %v154_v40, %v154_v40  ;;  %v155_v48 = vsub.f32 %v127_v41, %v771_v23  ;;  %v158_v59 = vsub.f32 %v139_v52, %v771_v23 }
  0x28   :  { %v161_v50 = vmul.f32 %v153_v42, %v153_v42  ;;  %v165_v61 = vmul.f32 %v157_v55, %v157_v55  ;;  %v159_v62 = vsub.f32 %v143_v56, %v771_v23  ;;  %v180_v63 = vsel %vm51_vm0, %v164_v58, 0.0 }
  0x29   :  { %v174_v53 = vsel %vm51_vm0, %v162_v47, 0.0  ;;  %v163_v54 = vmul.f32 %v155_v48, %v155_v48  ;;  %v166_v3 = vmul.f32 %v158_v59, %v158_v59  ;;  %v339_v35 = vrot.slane %v811_v24, 2 }
  0x2a   :  { %v171_v57 = vsel %vm51_vm0, %v161_v50, 0.0  ;;  %v183_v4 = vsel %vm51_vm0, %v165_v61, 0.0  ;;  %v167_v5 = vmul.f32 %v159_v62, %v159_v62  ;;  %v338_v36 = vrot.slane %v811_v24, 1 }
  0x2b   :  { %v177_v60 = vsel %vm51_vm0, %v163_v54, 0.0  ;;  %v186_v6 = vsel %vm51_vm0, %v166_v3, 0.0 }
  0x2c   :  { %v189_v7 = vsel %vm51_vm0, %v167_v5, 0.0 }
  0x46   :  { %169 = vadd.xlane.f32.xlu0 %v168_v46 }
  0x4a   :  { %175 = vadd.xlane.f32.xlu0 %v174_v53 }
  0x4b   :  { %172 = vadd.xlane.f32.xlu1 %v171_v57 }
  0x4e   :  { %178 = vadd.xlane.f32.xlu0 %v177_v60 }
  0x4f   :  { %181 = vadd.xlane.f32.xlu1 %v180_v63 }
  0x52   :  { %184 = vadd.xlane.f32.xlu0 %v183_v4 }
  0x53   :  { %187 = vadd.xlane.f32.xlu1 %v186_v6 }
  0x56   :  { %190 = vadd.xlane.f32.xlu0 %v189_v7 }
  0x8d   :  { %v215_v9 = vpop.permute.xlu1 %214  ;;  %v201_v10 = vpop.permute.xlu0 %200 }
  0x8e   :  { %vm253_vm2 = vcmp.eq.s32.totalorder %v215_v9, %v801_v8  ;;  %vm251_vm3 = vcmp.eq.s32.totalorder %v201_v10, %v801_v8 }
  0x8f   :  { %v661_v12 = vsel %vm253_vm2, 1.0, %v719_v11  ;;  %v659_v13 = vsel %vm251_vm3, 1.0, %v719_v11 }
  0x90   :  { %v290_v14 = vsel %vm275_vm1, %v661_v12, -inf  ;;  %v276_v15 = vsel %vm275_vm1, %v659_v13, -inf  ;;  %v340_v12 = vrot.slane %v811_v24, 3 }
  0x91   :  { %v291_v16 = vrot.slane %v290_v14, 4  ;;  %v277_v0 = vrot.slane %v276_v15, 4  ;;  %v222_v17 = vpop.permute.xlu1 %221  ;;  %v208_v18 = vpop.permute.xlu0 %207 }
  0x92   :  { %vm254_vm5 = vcmp.eq.s32.totalorder %v222_v17, %v801_v8  ;;  %vm252_vm6 = vcmp.eq.s32.totalorder %v208_v18, %v801_v8  ;;  %v341_v18 = vrot.slane %v811_v24, 4 }
  0x93   :  { %v292_v19 = vmax.f32 %v290_v14, %v291_v16  ;;  %v278_v20 = vmax.f32 %v276_v15, %v277_v0  ;;  %v662_v21 = vsel %vm254_vm5, 1.0, %v719_v11  ;;  %v660_v22 = vsel %vm252_vm6, 1.0, %v719_v11 }
  0x94   :  { %v297_v25 = vsel %vm275_vm1, %v662_v21, -inf  ;;  %v283_v26 = vsel %vm275_vm1, %v660_v22, -inf }
  0x95   :  { %v293_v27 = vrot.slane %v292_v19, 2  ;;  %v279_v28 = vrot.slane %v278_v20, 2  ;;  %v298_v29 = vrot.slane %v297_v25, 4  ;;  %v284_v30 = vrot.slane %v283_v26, 4  ;;  %v236_v31 = vpop.permute.xlu1 %235  ;;  %v229_v32 = vpop.permute.xlu0 %228 }
  0x96   :  { %vm256_vm7 = vcmp.eq.s32.totalorder %v236_v31, %v801_v8  ;;  %vm255_vm8 = vcmp.eq.s32.totalorder %v229_v32, %v801_v8 }
  0x97   :  { %v299_v33 = vmax.f32 %v297_v25, %v298_v29  ;;  %v285_v34 = vmax.f32 %v283_v26, %v284_v30  ;;  %v294_v37 = vmax.f32 %v292_v19, %v293_v27  ;;  %v280_v38 = vmax.f32 %v278_v20, %v279_v28 }
  0x98   :  { %v664_v39 = vsel %vm256_vm7, 1.0, %v719_v11  ;;  %v663_v40 = vsel %vm255_vm8, 1.0, %v719_v11  ;;  %v342_v28 = vrot.slane %v811_v24, 5  ;;  %v343_v29 = vrot.slane %v811_v24, 6 }
  0x99   :  { %v300_v41 = vrot.slane %v299_v33, 2  ;;  %v286_v42 = vrot.slane %v285_v34, 2  ;;  %v311_v43 = vsel %vm275_vm1, %v664_v39, -inf  ;;  %v304_v44 = vsel %vm275_vm1, %v663_v40, -inf  ;;  %v250_v45 = vpop.permute.xlu1 %249  ;;  %v243_v46 = vpop.permute.xlu0 %242 }
  0x9a   :  { %v312_v47 = vrot.slane %v311_v43, 4  ;;  %v305_v48 = vrot.slane %v304_v44, 4  ;;  %vm258_vm9 = vcmp.eq.s32.totalorder %v250_v45, %v801_v8  ;;  %vm257_vm10 = vcmp.eq.s32.totalorder %v243_v46, %v801_v8 }
  0x9b   :  { %v301_v49 = vmax.f32 %v299_v33, %v300_v41  ;;  %v287_v50 = vmax.f32 %v285_v34, %v286_v42  ;;  %v666_v51 = vsel %vm258_vm9, 1.0, %v719_v11  ;;  %v665_v52 = vsel %vm257_vm10, 1.0, %v719_v11 }
  0x9c   :  { %v313_v53 = vmax.f32 %v311_v43, %v312_v47  ;;  %v306_v54 = vmax.f32 %v304_v44, %v305_v48  ;;  %v325_v55 = vsel %vm275_vm1, %v666_v51, -inf  ;;  %v318_v56 = vsel %vm275_vm1, %v665_v52, -inf }
  0x9d   :  { %v326_v57 = vrot.slane %v325_v55, 4  ;;  %v319_v58 = vrot.slane %v318_v56, 4  ;;  %v281_v59 = vrot.slane %v280_v38, 1  ;;  %v295_v60 = vrot.slane %v294_v37, 1 }
  0x9e   :  { %v314_v61 = vrot.slane %v313_v53, 2  ;;  %v307_v62 = vrot.slane %v306_v54, 2  ;;  %v288_v63 = vrot.slane %v287_v50, 1  ;;  %v302_v3 = vrot.slane %v301_v49, 1 }
  0x9f   :  { %v327_v4 = vmax.f32 %v325_v55, %v326_v57  ;;  %v320_v5 = vmax.f32 %v318_v56, %v319_v58  ;;  %v825_v6 = vmax.f32 %v280_v38, %v281_v59  ;;  %v296_v7 = vmax.f32 %v294_v37, %v295_v60 }
  0xa0   :  { %v315_v9 = vmax.f32 %v313_v53, %v314_v61  ;;  %v308_v10 = vmax.f32 %v306_v54, %v307_v62  ;;  %v289_v11 = vmax.f32 %v287_v50, %v288_v63  ;;  %v303_v16 = vmax.f32 %v301_v49, %v302_v3  ;;  %v31_v61 = vld [vmem:[#allocation3] sm:$0xff]  ;;  %v33_v62 = vld [vmem:[#allocation3 + $0x8] sm:$0xff]  ;;  %v35_v63 = vld [vmem:[#allocation3 + $0x10] sm:$0xff] }
  0xa1   :  { %v328_v13 = vrot.slane %v327_v4, 2  ;;  %v321_v14 = vrot.slane %v320_v5, 2  ;;  %v353_v15 = vmul.f32 %v811_v24, %v825_v6  ;;  %v355_v25 = vmul.f32 %v339_v35, %v296_v7 }
  0xa2   :  { %v354_v0 = vmul.f32 %v338_v36, %v289_v11  ;;  %v309_v17 = vrot.slane %v308_v10, 1  ;;  %v316_v19 = vrot.slane %v315_v9, 1  ;;  %v356_v30 = vmul.f32 %v340_v12, %v303_v16 }
  0xa3   :  { %v329_v20 = vmax.f32 %v327_v4, %v328_v13  ;;  %v322_v21 = vmax.f32 %v320_v5, %v321_v14  ;;  %v499_v22 = vrot.slane %v353_v15, %v757_v2  ;;  %v363_v33 = vsub.f32 1.0, %v296_v7  ;;  %v37_v5 = vld [vmem:[#allocation3 + $0x18] sm:$0xff] }
  0xa4   :  { %v506_v26 = vrot.slane %v354_v0, %v757_v2  ;;  %v310_v27 = vmax.f32 %v308_v10, %v309_v17  ;;  %v317_v37 = vmax.f32 %v315_v9, %v316_v19  ;;  %v362_v38 = vsub.f32 1.0, %v289_v11 }
  0xa5   :  { %501 = vbcast.lane.b32.xlu1 %v499_v22, 256  ;;  %v323_v31 = vrot.slane %v322_v21, 1  ;;  %v330_v32 = vrot.slane %v329_v20, 1  ;;  %v364_v39 = vsub.f32 1.0, %v303_v16  ;;  %v513_v40 = vrot.slane %v355_v25, %v757_v2 }
  0xa6   :  { %508 = vbcast.lane.b32.xlu0 %v506_v26, 256  ;;  %v357_v34 = vmul.f32 %v341_v18, %v310_v27  ;;  %v842_v43 = vmul.f32 %v363_v33, %v339_v35  ;;  %v847_v45 = vmul.f32 %v362_v38, %v338_v36  ;;  %v520_v48 = vrot.slane %v356_v30, %v757_v2 }
  0xa7   :  { %v324_v41 = vmax.f32 %v322_v21, %v323_v31  ;;  %v331_v42 = vmax.f32 %v329_v20, %v330_v32  ;;  %v849_v46 = vmul.f32 %v364_v39, %v340_v12  ;;  %v344_v49 = vrot.slane %v811_v24, 7 }
  0xa8   :  { %v527_v44 = vrot.slane %v357_v34, %v757_v2  ;;  %v365_v50 = vsub.f32 1.0, %v310_v27  ;;  %v366_v51 = vsub.f32 1.0, %v317_v37  ;;  %v358_v52 = vmul.f32 %v342_v28, %v317_v37 }
  0xa9   :  { %515 = vbcast.lane.b32.xlu1 %v513_v40, 256  ;;  %v359_v47 = vmul.f32 %v343_v29, %v324_v41  ;;  %v367_v53 = vsub.f32 1.0, %v324_v41  ;;  %v368_v54 = vsub.f32 1.0, %v331_v42  ;;  %v360_v59 = vmul.f32 %v344_v49, %v331_v42 }
  0xaa   :  { %529 = vbcast.lane.b32.xlu0 %v527_v44, 256  ;;  %v854_v55 = vmul.f32 %v365_v50, %v341_v18  ;;  %v856_v36 = vmul.f32 %v366_v51, %v342_v28  ;;  %v534_v58 = vrot.slane %v358_v52, %v757_v2  ;;  %v40_v3 = vsub.f32 %v31_v61, %v33_v62 }
  0xab   :  { %v541_v35 = vrot.slane %v359_v47, %v757_v2  ;;  %v858_v56 = vmul.f32 %v367_v53, %v343_v29  ;;  %v860_v57 = vmul.f32 %v368_v54, %v344_v49  ;;  %v548_v60 = vrot.slane %v360_v59, %v757_v2 }
  0xac   :  { %v42_v4 = vsub.f32 %v31_v61, %v35_v63  ;;  %v41_v7 = vmul.f32 %v40_v3, %v40_v3  ;;  %v45_v10 = vsub.f32 %v35_v63, %v37_v5  ;;  %v48_v13 = vsub.f32 %v37_v5, %v771_v23 }
  0xad   :  { %522 = vbcast.lane.b32.xlu1 %v520_v48, 256  ;;  %v868_v21 = vsub.s32 %v801_v8, %v754_v1  ;;  %v361_v23 = vsub.f32 1.0, %v825_v6  ;;  %v879_v1 = vstv %s939_s2  ;;  %v559_v44 = vrot.slane %v847_v45, %v757_v2 }
  0xae   :  { %543 = vbcast.lane.b32.xlu0 %v541_v35, 256  ;;  %v43_v9 = vmul.f32 %v42_v4, %v42_v4  ;;  %v46_v12 = vmul.f32 %v45_v10, %v45_v10  ;;  %v49_v15 = vmul.f32 %v48_v13, %v48_v13  ;;  %v563_v51 = vrot.slane %v842_v43, %v757_v2 }
  0xaf   :  { %v369_v31 = vmul.f32 %v811_v24, %v361_v23  ;;  %v571_v62 = vrot.slane %v854_v55, %v757_v2  ;;  %v567_v43 = vrot.slane %v849_v46, %v757_v2  ;;  %v579_v5 = vrot.slane %v858_v56, %v757_v2 }
  0xb0   :  { %v44_v11 = vadd.f32 %v43_v9, %v41_v7 }
  0xb1   :  { %536 = vbcast.lane.b32.xlu1 %v534_v58, 256  ;;  %v555_v39 = vrot.slane %v369_v31, %v757_v2 }
  0xb2   :  { %v47_v14 = vadd.f32 %v46_v12, %v44_v11 }
  0xb4   :  { %v50_v16 = vadd.f32 %v49_v15, %v47_v14 }
  0xb5   :  { %550 = vbcast.lane.b32.xlu1 %v548_v60, 256 }
  0xb6   :  { %v52_v0 = vsel %vm51_vm0, %v50_v16, 0.0 }
  0xcd   :  { %53 = vadd.xlane.f32.xlu0 %v52_v0 }
  0xd3   :  { %v170_v17 = vpop.xlane.xlu0 %169 }
  0xd4   :  { %v388_v25 = vrot.slane %v170_v17, %v868_v21 }
  0xd6   :  { %v479_v29 = vsub.f32 %v170_v17, %v388_v25 }
  0xd7   :  { %v176_v18 = vpop.xlane.xlu0 %175 }
  0xd8   :  { %v173_v19 = vpop.xlane.xlu1 %172  ;;  %v396_v28 = vrot.slane %v176_v18, %v868_v21  ;;  %v488_v37 = vadd.f32 %v879_v1, %v479_v29 }
  0xd9   :  { %v392_v27 = vrot.slane %v173_v19, %v868_v21 }
  0xda   :  { %v481_v34 = vsub.f32 %v176_v18, %v396_v28  ;;  %v600_v35 = vmax.f32 %v488_v37, 0.0 }
  0xdb   :  { %v179_v20 = vpop.xlane.xlu0 %178  ;;  %v480_v8 = vsub.f32 %v173_v19, %v392_v27 }
  0xdc   :  { %v182_v22 = vpop.xlane.xlu1 %181  ;;  %v400_v6 = vrot.slane %v179_v20, %v868_v21  ;;  %v490_v49 = vadd.f32 %v879_v1, %v481_v34 }
  0xdd   :  { %v404_v30 = vrot.slane %v182_v22, %v868_v21  ;;  %v489_v40 = vadd.f32 %v879_v1, %v480_v8 }
  0xde   :  { %v482_v50 = vsub.f32 %v179_v20, %v400_v6  ;;  %v602_v7 = vmax.f32 %v490_v49, 0.0 }
  0xdf   :  { %v185_v26 = vpop.xlane.xlu0 %184  ;;  %v483_v38 = vsub.f32 %v182_v22, %v404_v30  ;;  %v601_v59 = vmax.f32 %v489_v40, 0.0 }
  0xe0   :  { %v188_v32 = vpop.xlane.xlu1 %187  ;;  %v408_v54 = vrot.slane %v185_v26, %v868_v21  ;;  %v491_v9 = vadd.f32 %v879_v1, %v482_v50 }
  0xe1   :  { %v412_v41 = vrot.slane %v188_v32, %v868_v21  ;;  %v492_v53 = vadd.f32 %v879_v1, %v483_v38  ;;  %v583_v38 = vrot.slane %v860_v57, %v757_v2 }
  0xe2   :  { %v484_v13 = vsub.f32 %v185_v26, %v408_v54  ;;  %v603_v22 = vmax.f32 %v491_v9, 0.0 }
  0xe3   :  { %v191_v33 = vpop.xlane.xlu0 %190  ;;  %v485_v60 = vsub.f32 %v188_v32, %v412_v41  ;;  %v604_v12 = vmax.f32 %v492_v53, 0.0 }
  0xe4   :  { %v416_v14 = vrot.slane %v191_v33, %v868_v21  ;;  %v575_v21 = vrot.slane %v856_v36, %v757_v2  ;;  %v493_v23 = vadd.f32 %v879_v1, %v484_v13 }
  0xe5   :  { %v494_v15 = vadd.f32 %v879_v1, %v485_v60 }
  0xe6   :  { %v486_v27 = vsub.f32 %v191_v33, %v416_v14  ;;  %v605_v36 = vmax.f32 %v493_v23, 0.0 }
  0xe7   :  { %v606_v30 = vmax.f32 %v494_v15, 0.0 }
 0x117   :  { %v502_v42 = vpop.permute.xlu1 %501 }
 0x118   :  { %v584_v47 = vmul.f32 %v555_v39, %v502_v42  ;;  %v509_v48 = vpop.permute.xlu0 %508  ;;  %v495_v39 = vadd.f32 %v879_v1, %v486_v27 }
 0x119   :  { %v585_v52 = vmul.f32 %v559_v44, %v509_v48 }
 0x11a   :  { %v592_v58 = vmul.f32 %v811_v24, %v584_v47  ;;  %v607_v50 = vmax.f32 %v495_v39, 0.0 }
 0x11b   :  { %v516_v45 = vpop.permute.xlu1 %515  ;;  %v593_v61 = vmul.f32 %v811_v24, %v585_v52 }
 0x11c   :  { %v608_v63 = vmul.f32 %v600_v35, %v592_v58  ;;  %v586_v3 = vmul.f32 %v563_v51, %v516_v45  ;;  %v530_v4 = vpop.permute.xlu0 %529 }
 0x11d   :  { %v609_v10 = vmul.f32 %v601_v59, %v593_v61  ;;  %v588_v11 = vmul.f32 %v571_v62, %v530_v4 }
 0x11e   :  { %v594_v55 = vmul.f32 %v811_v24, %v586_v3  ;;  %v617_v16 = vsel %vm616_vm11, %v608_v63, 0.0 }
 0x11f   :  { %v618_v46 = vsel %vm616_vm11, %v609_v10, 0.0  ;;  %v523_v0 = vpop.permute.xlu1 %522  ;;  %v596_v56 = vmul.f32 %v811_v24, %v588_v11 }
 0x120   :  { %v610_v17 = vmul.f32 %v602_v7, %v594_v55  ;;  %v619_v18 = vadd.f32 %v618_v46, %v617_v16  ;;  %v587_v19 = vmul.f32 %v567_v43, %v523_v0  ;;  %v544_v20 = vpop.permute.xlu0 %543 }
 0x121   :  { %v612_v25 = vmul.f32 %v604_v12, %v596_v56  ;;  %v590_v26 = vmul.f32 %v579_v5, %v544_v20 }
 0x122   :  { %v620_v28 = vsel %vm616_vm11, %v610_v17, 0.0  ;;  %v595_v29 = vmul.f32 %v811_v24, %v587_v19 }
 0x123   :  { %v621_v31 = vadd.f32 %v620_v28, %v619_v18  ;;  %v537_v8 = vpop.permute.xlu1 %536  ;;  %v598_v32 = vmul.f32 %v811_v24, %v590_v26  ;;  %v624_v44 = vsel %vm616_vm11, %v612_v25, 0.0 }
 0x124   :  { %v611_v34 = vmul.f32 %v603_v22, %v595_v29  ;;  %v589_v6 = vmul.f32 %v575_v21, %v537_v8 }
 0x125   :  { %v614_v37 = vmul.f32 %v606_v30, %v598_v32 }
 0x126   :  { %v622_v33 = vsel %vm616_vm11, %v611_v34, 0.0  ;;  %v597_v40 = vmul.f32 %v811_v24, %v589_v6 }
 0x127   :  { %v623_v41 = vadd.f32 %v622_v33, %v621_v31  ;;  %v551_v42 = vpop.permute.xlu1 %550  ;;  %v628_v1 = vsel %vm616_vm11, %v614_v37, 0.0 }
 0x128   :  { %v613_v47 = vmul.f32 %v605_v36, %v597_v40  ;;  %v591_v48 = vmul.f32 %v583_v38, %v551_v42 }
 0x129   :  { %v625_v49 = vadd.f32 %v624_v44, %v623_v41 }
 0x12a   :  { %v626_v51 = vsel %vm616_vm11, %v613_v47, 0.0  ;;  %v599_v52 = vmul.f32 %v811_v24, %v591_v48 }
 0x12b   :  { %v627_v2 = vadd.f32 %v626_v51, %v625_v49 }
 0x12c   :  { %v615_v57 = vmul.f32 %v607_v50, %v599_v52 }
 0x12d   :  { %v629_v35 = vadd.f32 %v628_v1, %v627_v2 }
 0x12e   :  { %v630_v53 = vsel %vm616_vm11, %v615_v57, 0.0 }
 0x12f   :  { %v631_v54 = vadd.f32 %v630_v53, %v629_v35 }
 0x131   :  { %v632_v58 = vsel %vm616_vm11, %v631_v54, 0.0 }
 0x132   :  { %633 = vadd.xlane.f32.xlu1 %v632_v58 }
 0x15a   :  { %v54_v59 = vpop.xlane.xlu0 %53 }
 0x15b   :  { %v55_v60 = vrot.slane %v54_v59, 4 }
 0x15d   :  { %v56_v45 = vadd.f32 %v55_v60, %v54_v59 }
 0x15f   :  { %v57_v61 = vrot.slane %v56_v45, 2 }
 0x161   :  { %v58_v62 = vadd.f32 %v57_v61, %v56_v45 }
 0x163   :  { %v59_v63 = vrot.slane %v58_v62, 1 }
 0x165   :  { %v60_v3 = vadd.f32 %v59_v63, %v58_v62 }
 0x167   :  { %668 = vpush %v60_v3 }
 0x198   :  { %s669_s2 = spop %668 }
 0x1bf   :  { %v634_v24 = vpop.xlane.xlu1 %633 }
 0x1c0   :  { %v635_v43 = vrot.slane %v634_v24, 4 }
 0x1c2   :  { %v636_v4 = vadd.f32 %v635_v43, %v634_v24 }
 0x1c4   :  { %v637_v5 = vrot.slane %v636_v4, 2 }
 0x1c6   :  { %v638_v7 = vadd.f32 %v637_v5, %v636_v4 }
 0x1c8   :  { %v639_v9 = vrot.slane %v638_v7, 1 }
 0x1ca   :  { %v640_v10 = vadd.f32 %v639_v9, %v638_v7 }
 0x1cc   :  { %670 = vpush %v640_v10 }
 0x1fd   :  { %s671_s28 = spop %670 }
 0x1fe   :  { %s642_s29 = sadd.f32 %s671_s28, %s669_s2 }
 0x200   :  { %644 = sst [smem:[#allocation6]] %s642_s29 }
 0x201   :  { %710 = shalt.err (!%p707_p10)
}
 0x202   :  { %s720_s10 = smov [#allocation6]  }
 0x203   :  { %652 = dma.smem_to_hbm %s720_s10, 16, %s940_s3, [#allocation5]  }
 0x204   :  { %713 = dma.done.wait [#allocation5], 16  }
 0x205   :  { %714 = vsyncadd [#allocation5], 4294967280 }
 0x206   :  { %656 = sfence }
 0x207   :  { %657 = vsyncpa [#allocation4], 1 }
 0x208   :  { %658 = vsyncpa [#allocation5], 1 }

</bundles_post_ra>
